<compile_context>
chip_gen: v7x
topology: tpu7x:2x2x1
jax: 0.10.0
libtpu: 0.0.40
codegen_flags: <defaults>
</compile_context>

<pallas_src>
import numpy as np

import jax
import jax.numpy as jnp
from jax.experimental import pallas as pl
from jax.experimental.pallas import tpu as pltpu


def _cbam_kernel(x_ref, w1_ref, b1_ref, w2_ref, b2_ref, k_ref, bc_ref, o_ref):
    # x_ref : (bt, C, HW)   native dtype, lane-dense (HW on lanes)
    # w1_ref: (Cr, C) if C < 128 else (C, Cr)   f32
    # b1_ref: (1, Cr)  f32
    # w2_ref: (Cr, C)  f32   (nn.Linear(Cr, C) weight, pre-transposed)
    # b2_ref: (1, C)   f32
    # k_ref : (2, HW, HW) f32  conv "shift" matrices (ch0 = max-pool, ch1 = mean)
    # bc_ref: (1,) f32 in SMEM (conv bias)
    _, C, HW = x_ref.shape

    x = x_ref[...]                                               # native dtype

    # ---------------- Channel attention ----------------
    # Global average pool over the lane-dense spatial axis (f32 accumulation).
    y = jnp.sum(x, axis=2, dtype=jnp.float32) * (1.0 / HW)       # (bt, C)

    if C >= 128:
        # Real CBAM channel counts: small MXU matmuls.
        h = jnp.dot(y, w1_ref[...], preferred_element_type=jnp.float32) + b1_ref[...]
        h = jnp.maximum(h, 0.0)                                  # (bt, Cr)
        z = jnp.dot(h, w2_ref[...], preferred_element_type=jnp.float32) + b2_ref[...]
    else:
        # Tiny C: broadcast-multiply + reduce on the VPU (MXU not worth it).
        h = jnp.sum(y[:, None, :] * w1_ref[...][None, :, :], axis=-1) + b1_ref[...]
        h = jnp.maximum(h, 0.0)                                  # (bt, Cr)
        z = jnp.sum(h[:, :, None] * w2_ref[...][None, :, :], axis=1) + b2_ref[...]

    s = jax.nn.sigmoid(z).astype(x.dtype)                        # (bt, C)
    x_ca = x * s[:, :, None]                                     # (bt, C, HW)

    # ---------------- Spatial attention ----------------
    mx = jnp.max(x_ca, axis=1).astype(jnp.float32)               # (bt, HW)
    mn = jnp.sum(x_ca, axis=1, dtype=jnp.float32) * (1.0 / C)    # (bt, HW)

    # 7x7, 2->1 channel conv (zero padding folded into K) as two MXU matmuls.
    conv = (jnp.dot(mx, k_ref[0], preferred_element_type=jnp.float32)
            + jnp.dot(mn, k_ref[1], preferred_element_type=jnp.float32)
            + bc_ref[0])                                         # (bt, HW)
    g = jax.nn.sigmoid(conv).astype(x.dtype)                     # (bt, HW)

    o_ref[...] = x_ca * g[:, None, :]


def _build_conv_matrices(wc, H, W):
    """K[c, in_pix, out_pix] s.t. conv_out[:, out] = sum_in pooled_c[:, in] * K[c, in, out].

    Encodes the 7x7 cross-correlation with padding=3 (zero padding folded in).
    Index pattern is static (numpy); values come from the (traced) conv weight.
    """
    HW = H * W
    ky, kx, y, x = np.meshgrid(np.arange(7), np.arange(7),
                               np.arange(H), np.arange(W), indexing="ij")
    yy = y + ky - 3
    xx = x + kx - 3
    valid = (yy >= 0) & (yy < H) & (xx >= 0) & (xx < W)
    rows = (yy * W + xx)[valid]          # input pixel index
    cols = (y * W + x)[valid]            # output pixel index
    taps = (ky * 7 + kx)[valid]          # which of the 49 taps

    wflat = wc.reshape(2, 49).astype(jnp.float32)
    K = jnp.zeros((2, HW, HW), jnp.float32)
    K = K.at[0, rows, cols].add(wflat[0, taps])   # channel 0 <- max pool
    K = K.at[1, rows, cols].add(wflat[1, taps])   # channel 1 <- mean pool
    return K


def _vmem_limit_bytes():
    """Scoped VMEM limit: physical capacity minus ~24 MiB headroom, capped at 100 MiB."""
    try:
        cap = pltpu.get_tpu_info().vmem_capacity_bytes
    except Exception:
        cap = 64 * 1024 * 1024           # conservative default (v7x per-core VMEM)
    return int(max(32 * 1024 * 1024, min(cap - 24 * 1024 * 1024, 100 * 1024 * 1024)))


def _pick_batch_tile(B, bytes_per_batch, budget_bytes):
    """Largest batch tile (divisor of B) whose block fits the per-block budget."""
    bt = min(B, max(1, budget_bytes // max(1, bytes_per_batch)))
    while bt > 1 and B % bt != 0:
        bt -= 1
    # v7x megacore: if everything fits in one step, split into two parallel
    # steps only when both halves stay large enough to amortize per-step cost.
    if bt == B and B % 2 == 0 and (B // 2) * bytes_per_batch >= (2 << 20):
        bt = B // 2
    return int(bt)


def cbam(x, w1, b1, w2, b2, wc, bc):
    """CBAM forward pass.

    x:  (B, C, H, W)
    w1: (Cr, C), b1: (Cr,)      -- nn.Linear(C, Cr) weight/bias (PyTorch layout)
    w2: (C, Cr), b2: (C,)       -- nn.Linear(Cr, C) weight/bias
    wc: (1, 2, 7, 7), bc: (1,)  -- nn.Conv2d(2, 1, 7, padding=3) weight/bias
    """
    B, C, H, W = x.shape
    Cr = w1.shape[0]
    HW = H * W

    # Lane-dense view of the hot data path.
    x2 = x.reshape(B, C, HW)

    itemsize = jnp.dtype(x.dtype).itemsize
    vmem_limit = _vmem_limit_bytes()
    # ~6x working-set multiplier: 2x input block + 2x output block + live x_ca /
    # compiler temporaries (+ small constants).
    bt = _pick_batch_tile(B, C * HW * itemsize, vmem_limit // 6)
    grid = (B // bt,)
    # TODO(synk): for very large C*H*W where even a single-batch block exceeds the
    # budget, add spatial tiling with 3-pixel conv halos instead of bt=1 fallback.

    use_mxu_mlp = C >= 128
    w1k = (jnp.transpose(w1) if use_mxu_mlp else w1).astype(jnp.float32)  # (C,Cr) or (Cr,C)
    w2k = jnp.transpose(w2).astype(jnp.float32)                           # (Cr, C)
    b1k = b1.reshape(1, Cr).astype(jnp.float32)
    b2k = b2.reshape(1, C).astype(jnp.float32)
    kmat = _build_conv_matrices(wc, H, W)                                  # (2, HW, HW)
    bck = bc.reshape(-1).astype(jnp.float32)                               # (1,)

    out = pl.pallas_call(
        _cbam_kernel,
        out_shape=jax.ShapeDtypeStruct((B, C, HW), x.dtype),
        grid_spec=pltpu.PrefetchScalarGridSpec(
            num_scalar_prefetch=0,
            grid=grid,
            in_specs=[
                pl.BlockSpec((bt, C, HW), lambda b: (b, 0, 0)),            # x (lane-dense)
                pl.BlockSpec(w1k.shape, lambda b: (0, 0)),                 # w1 (layout per path)
                pl.BlockSpec((1, Cr), lambda b: (0, 0)),                   # b1
                pl.BlockSpec((Cr, C), lambda b: (0, 0)),                   # w2^T
                pl.BlockSpec((1, C), lambda b: (0, 0)),                    # b2
                pl.BlockSpec((2, HW, HW), lambda b: (0, 0, 0)),            # conv shift matrices
                pl.BlockSpec(memory_space=pltpu.MemorySpace.SMEM),         # conv bias scalar
            ],
            out_specs=pl.BlockSpec((bt, C, HW), lambda b: (b, 0, 0)),
        ),
        compiler_params=pltpu.CompilerParams(
            dimension_semantics=("parallel",),
            vmem_limit_bytes=vmem_limit,
        ),
    )(x2, w1k, b1k, w2k, b2k, kmat, bck)

    return out.reshape(B, C, H, W)


def cbam_ref(x, w1, b1, w2, b2, wc, bc):
    """Pure-JAX reference matching the PyTorch CBAM forward."""
    hp = jax.lax.Precision.HIGHEST
    # Channel attention
    y = jnp.mean(x, axis=(2, 3))                                    # (B, C)
    h = jnp.maximum(jnp.dot(y, w1.T, precision=hp) + b1, 0.0)       # (B, Cr)
    z = jnp.dot(h, w2.T, precision=hp) + b2                         # (B, C)
    x = x * jax.nn.sigmoid(z)[:, :, None, None]
    # Spatial attention
    mx = jnp.max(x, axis=1, keepdims=True)
    mn = jnp.mean(x, axis=1, keepdims=True)
    y2 = jnp.concatenate([mx, mn], axis=1)                          # (B, 2, H, W)
    conv = jax.lax.conv_general_dilated(
        y2, wc, window_strides=(1, 1), padding=((3, 3), (3, 3)),
        dimension_numbers=("NCHW", "OIHW", "NCHW"), precision=hp)
    conv = conv + bc.reshape(1, 1, 1, 1)
    return x * jax.nn.sigmoid(conv)


if __name__ == "__main__":
    B, C, H, W = 2, 32, 16, 16
    reduction_ratio = 8
    Cr = C // reduction_ratio  # = 4

    key = jax.random.PRNGKey(0)
    kx, k1, k2, k3, k4, k5, k6 = jax.random.split(key, 7)

    x = jax.random.normal(kx, (B, C, H, W), dtype=jnp.float32)

    # Deterministic init, PyTorch-like uniform bounds, PyTorch weight layouts.
    bound1 = 1.0 / (C ** 0.5)
    w1 = jax.random.uniform(k1, (Cr, C), jnp.float32, -bound1, bound1)
    b1 = jax.random.uniform(k2, (Cr,), jnp.float32, -bound1, bound1)
    bound2 = 1.0 / (Cr ** 0.5)
    w2 = jax.random.uniform(k3, (C, Cr), jnp.float32, -bound2, bound2)
    b2 = jax.random.uniform(k4, (C,), jnp.float32, -bound2, bound2)
    boundc = 1.0 / ((2 * 7 * 7) ** 0.5)
    wc = jax.random.uniform(k5, (1, 2, 7, 7), jnp.float32, -boundc, boundc)
    bc = jax.random.uniform(k6, (1,), jnp.float32, -boundc, boundc)

    out = cbam(x, w1, b1, w2, b2, wc, bc)
    out = jax.block_until_ready(out)

    ref = cbam_ref(x, w1, b1, w2, b2, wc, bc)
    assert out.shape == (B, C, H, W)
    # The spatial 7x7 conv now runs as f32 MXU matmuls inside the kernel; the
    # tolerance is relaxed slightly vs a pure-VPU path to stay robust to the
    # MXU's f32 pass behaviour while still catching any structural mismatch.
    assert jnp.allclose(out, ref, atol=1e-3, rtol=1e-3), "mismatch vs reference"

    print("KERNEL_OK")
</pallas_src>

<mosaic_0001>
module attributes {stable_mosaic.version = 11 : i64} {
  func.func @_cbam_kernel(%arg0: i32, %arg1: memref<2x32x256xf32, #tpu.memory_space<vmem>>, %arg2: memref<4x32xf32, #tpu.memory_space<vmem>>, %arg3: memref<1x4xf32, #tpu.memory_space<vmem>>, %arg4: memref<4x32xf32, #tpu.memory_space<vmem>>, %arg5: memref<1x32xf32, #tpu.memory_space<vmem>>, %arg6: memref<2x256x256xf32, #tpu.memory_space<vmem>>, %arg7: memref<1xf32, #tpu.memory_space<smem>>, %arg8: memref<2x32x256xf32, #tpu.memory_space<vmem>>) attributes {dimension_semantics = [#tpu.dimension_semantics<parallel>], iteration_bounds = array<i64: 1>, scalar_prefetch = 0 : i64, scratch_operands = 0 : i64, tpu.core_type = #tpu.core_type<tc>, window_params = [{transform_indices = @transform_0, window_bounds = array<i64: 2, 32, 256>}, {pipeline_mode = #tpu.pipeline_mode<synchronous>, transform_indices = @transform_1, window_bounds = array<i64: 4, 32>}, {pipeline_mode = #tpu.pipeline_mode<synchronous>, transform_indices = @transform_2, window_bounds = array<i64: 1, 4>}, {pipeline_mode = #tpu.pipeline_mode<synchronous>, transform_indices = @transform_3, window_bounds = array<i64: 4, 32>}, {pipeline_mode = #tpu.pipeline_mode<synchronous>, transform_indices = @transform_4, window_bounds = array<i64: 1, 32>}, {pipeline_mode = #tpu.pipeline_mode<synchronous>, transform_indices = @transform_5, window_bounds = array<i64: 2, 256, 256>}, {transform_indices = @transform_6, window_bounds = array<i64: 1>}, {transform_indices = @transform_7, window_bounds = array<i64: 2, 32, 256>}]} {
    %c0 = arith.constant 0 : index
    %c0_0 = arith.constant 0 : index
    %c0_1 = arith.constant 0 : index
    %0 = vector.load %arg1[%c0, %c0_0, %c0_1] : memref<2x32x256xf32, #tpu.memory_space<vmem>>, vector<2x32x256xf32>
    %cst = arith.constant dense<0.000000e+00> : vector<2x32xf32>
    %1 = vector.multi_reduction <add>, %0, %cst [2] : vector<2x32x256xf32> to vector<2x32xf32>
    %cst_2 = arith.constant 3.906250e-03 : f32
    %2 = vector.broadcast %cst_2 : f32 to vector<2x32xf32>
    %3 = arith.mulf %1, %2 : vector<2x32xf32>
    %4 = vector.shape_cast %3 : vector<2x32xf32> to vector<2x1x32xf32>
    %c0_3 = arith.constant 0 : index
    %c0_4 = arith.constant 0 : index
    %5 = vector.load %arg2[%c0_3, %c0_4] : memref<4x32xf32, #tpu.memory_space<vmem>>, vector<4x32xf32>
    %6 = vector.shape_cast %5 : vector<4x32xf32> to vector<1x4x32xf32>
    %7 = vector.broadcast %4 : vector<2x1x32xf32> to vector<2x4x32xf32>
    %8 = vector.broadcast %6 : vector<1x4x32xf32> to vector<2x4x32xf32>
    %9 = arith.mulf %7, %8 : vector<2x4x32xf32>
    %cst_5 = arith.constant dense<0.000000e+00> : vector<2x4xf32>
    %10 = vector.multi_reduction <add>, %9, %cst_5 [2] : vector<2x4x32xf32> to vector<2x4xf32>
    %c0_6 = arith.constant 0 : index
    %c0_7 = arith.constant 0 : index
    %11 = vector.load %arg3[%c0_6, %c0_7] : memref<1x4xf32, #tpu.memory_space<vmem>>, vector<1x4xf32>
    %12 = vector.broadcast %11 : vector<1x4xf32> to vector<2x4xf32>
    %13 = arith.addf %10, %12 : vector<2x4xf32>
    %cst_8 = arith.constant 0.000000e+00 : f32
    %14 = vector.broadcast %cst_8 : f32 to vector<2x4xf32>
    %15 = arith.maximumf %13, %14 : vector<2x4xf32>
    %16 = vector.shape_cast %15 : vector<2x4xf32> to vector<2x4x1xf32>
    %c0_9 = arith.constant 0 : index
    %c0_10 = arith.constant 0 : index
    %17 = vector.load %arg4[%c0_9, %c0_10] : memref<4x32xf32, #tpu.memory_space<vmem>>, vector<4x32xf32>
    %18 = vector.shape_cast %17 : vector<4x32xf32> to vector<1x4x32xf32>
    %19 = vector.broadcast %16 : vector<2x4x1xf32> to vector<2x4x32xf32>
    %20 = vector.broadcast %18 : vector<1x4x32xf32> to vector<2x4x32xf32>
    %21 = arith.mulf %19, %20 : vector<2x4x32xf32>
    %cst_11 = arith.constant dense<0.000000e+00> : vector<2x32xf32>
    %22 = vector.multi_reduction <add>, %21, %cst_11 [1] : vector<2x4x32xf32> to vector<2x32xf32>
    %c0_12 = arith.constant 0 : index
    %c0_13 = arith.constant 0 : index
    %23 = vector.load %arg5[%c0_12, %c0_13] : memref<1x32xf32, #tpu.memory_space<vmem>>, vector<1x32xf32>
    %24 = vector.broadcast %23 : vector<1x32xf32> to vector<2x32xf32>
    %25 = arith.addf %22, %24 : vector<2x32xf32>
    %26 = arith.negf %25 : vector<2x32xf32>
    %27 = math.exp %26 : vector<2x32xf32>
    %cst_14 = arith.constant 1.000000e+00 : f32
    %28 = vector.broadcast %cst_14 : f32 to vector<2x32xf32>
    %29 = arith.addf %28, %27 : vector<2x32xf32>
    %30 = arith.divf %28, %29 : vector<2x32xf32>
    %31 = vector.shape_cast %30 : vector<2x32xf32> to vector<2x32x1xf32>
    %32 = vector.broadcast %31 : vector<2x32x1xf32> to vector<2x32x256xf32>
    %33 = arith.mulf %0, %32 : vector<2x32x256xf32>
    %cst_15 = arith.constant dense<0xFF800000> : vector<2x256xf32>
    %34 = vector.multi_reduction <maximumf>, %33, %cst_15 [1] : vector<2x32x256xf32> to vector<2x256xf32>
    %cst_16 = arith.constant dense<0.000000e+00> : vector<2x256xf32>
    %35 = vector.multi_reduction <add>, %33, %cst_16 [1] : vector<2x32x256xf32> to vector<2x256xf32>
    %cst_17 = arith.constant 3.125000e-02 : f32
    %36 = vector.broadcast %cst_17 : f32 to vector<2x256xf32>
    %37 = arith.mulf %35, %36 : vector<2x256xf32>
    %c0_18 = arith.constant 0 : index
    %c0_19 = arith.constant 0 : index
    %c0_20 = arith.constant 0 : index
    %38 = vector.load %arg6[%c0_18, %c0_19, %c0_20] : memref<2x256x256xf32, #tpu.memory_space<vmem>>, vector<1x256x256xf32>
    %39 = vector.shape_cast %38 : vector<1x256x256xf32> to vector<256x256xf32>
    %cst_21 = arith.constant dense<0.000000e+00> : vector<2x256xf32>
    %40 = tpu.matmul %34, %39, %cst_21 {dimension_numbers = #tpu.dot_dimension_numbers<[1], [0], [0], [1], [0, 0, 1, 1], [], []>} : vector<2x256xf32>, vector<256x256xf32>, vector<2x256xf32> -> vector<2x256xf32>
    %c1 = arith.constant 1 : index
    %c0_22 = arith.constant 0 : index
    %c0_23 = arith.constant 0 : index
    %41 = vector.load %arg6[%c1, %c0_22, %c0_23] : memref<2x256x256xf32, #tpu.memory_space<vmem>>, vector<1x256x256xf32>
    %42 = vector.shape_cast %41 : vector<1x256x256xf32> to vector<256x256xf32>
    %cst_24 = arith.constant dense<0.000000e+00> : vector<2x256xf32>
    %43 = tpu.matmul %37, %42, %cst_24 {dimension_numbers = #tpu.dot_dimension_numbers<[1], [0], [0], [1], [0, 0, 1, 1], [], []>} : vector<2x256xf32>, vector<256x256xf32>, vector<2x256xf32> -> vector<2x256xf32>
    %44 = arith.addf %40, %43 : vector<2x256xf32>
    %c0_25 = arith.constant 0 : index
    %45 = memref.load %arg7[%c0_25] : memref<1xf32, #tpu.memory_space<smem>>
    %46 = vector.broadcast %45 : f32 to vector<2x256xf32>
    %47 = arith.addf %44, %46 : vector<2x256xf32>
    %48 = arith.negf %47 : vector<2x256xf32>
    %49 = math.exp %48 : vector<2x256xf32>
    %cst_26 = arith.constant 1.000000e+00 : f32
    %50 = vector.broadcast %cst_26 : f32 to vector<2x256xf32>
    %51 = arith.addf %50, %49 : vector<2x256xf32>
    %52 = arith.divf %50, %51 : vector<2x256xf32>
    %53 = vector.shape_cast %52 : vector<2x256xf32> to vector<2x1x256xf32>
    %54 = vector.broadcast %53 : vector<2x1x256xf32> to vector<2x32x256xf32>
    %55 = arith.mulf %33, %54 : vector<2x32x256xf32>
    %c0_27 = arith.constant 0 : index
    %c0_28 = arith.constant 0 : index
    %c0_29 = arith.constant 0 : index
    %56 = vector.load %arg8[%c0_27, %c0_28, %c0_29] : memref<2x32x256xf32, #tpu.memory_space<vmem>>, vector<2x32x256xf32>
    tpu.vector_store %arg8[%c0_27, %c0_28, %c0_29], %55 {strides = array<i32>} : memref<2x32x256xf32, #tpu.memory_space<vmem>>, vector<2x32x256xf32>,
    return
  }
  func.func @transform_0(%arg0: i32) -> (i32, i32, i32) {
    %c0_i32 = arith.constant 0 : i32
    %c0_i32_0 = arith.constant 0 : i32
    %c0_i32_1 = arith.constant 0 : i32
    return %arg0, %c0_i32, %c0_i32_0 : i32, i32, i32
  }
  func.func @transform_1(%arg0: i32) -> (i32, i32) {
    %c0_i32 = arith.constant 0 : i32
    %c0_i32_0 = arith.constant 0 : i32
    %c0_i32_1 = arith.constant 0 : i32
    return %c0_i32, %c0_i32_0 : i32, i32
  }
  func.func @transform_2(%arg0: i32) -> (i32, i32) {
    %c0_i32 = arith.constant 0 : i32
    %c0_i32_0 = arith.constant 0 : i32
    %c0_i32_1 = arith.constant 0 : i32
    return %c0_i32, %c0_i32_0 : i32, i32
  }
  func.func @transform_3(%arg0: i32) -> (i32, i32) {
    %c0_i32 = arith.constant 0 : i32
    %c0_i32_0 = arith.constant 0 : i32
    %c0_i32_1 = arith.constant 0 : i32
    return %c0_i32, %c0_i32_0 : i32, i32
  }
  func.func @transform_4(%arg0: i32) -> (i32, i32) {
    %c0_i32 = arith.constant 0 : i32
    %c0_i32_0 = arith.constant 0 : i32
    %c0_i32_1 = arith.constant 0 : i32
    return %c0_i32, %c0_i32_0 : i32, i32
  }
  func.func @transform_5(%arg0: i32) -> (i32, i32, i32) {
    %c0_i32 = arith.constant 0 : i32
    %c0_i32_0 = arith.constant 0 : i32
    %c0_i32_1 = arith.constant 0 : i32
    %c0_i32_2 = arith.constant 0 : i32
    return %c0_i32, %c0_i32_0, %c0_i32_1 : i32, i32, i32
  }
  func.func @transform_6(%arg0: i32) -> i32 {
    %c0_i32 = arith.constant 0 : i32
    %c0_i32_0 = arith.constant 0 : i32
    return %c0_i32 : i32
  }
  func.func @transform_7(%arg0: i32) -> (i32, i32, i32) {
    %c0_i32 = arith.constant 0 : i32
    %c0_i32_0 = arith.constant 0 : i32
    %c0_i32_1 = arith.constant 0 : i32
    return %arg0, %c0_i32, %c0_i32_0 : i32, i32, i32
  }
}

</mosaic_0001>

<bundles_post_ra>
// kernel: tpu_custom_call.1
= control target key start
LH: loop header
LB: loop body
LE: loop exit
PB: predicated region body
PF: predicated region fallthrough
CT: control target
= control target key end

     0   :  { %13 = vsyncpa [#allocation4], 0  ;;  %s1707_s0 = inlined_call_operand.hbm [shape: f32[2,32,256], index: 0, kind: input, shape index: {}]   ;;  %s1708_s1 = inlined_call_operand.vmem [shape: f32[4,32], index: 1, kind: input, shape index: {}]   ;;  %s1709_s2 = inlined_call_operand.vmem [shape: f32[1,4], index: 2, kind: input, shape index: {}]   ;;  %s1710_s3 = inlined_call_operand.vmem [shape: f32[4,32], index: 3, kind: input, shape index: {}]   ;;  %s1711_s4 = inlined_call_operand.vmem [shape: f32[1,32], index: 4, kind: input, shape index: {}]   ;;  %s1712_s5 = inlined_call_operand.hbm [shape: f32[2,256,256], index: 5, kind: input, shape index: {}]   ;;  %s1713_s6 = inlined_call_operand.<no memory space> [shape: f32[1], index: 6, kind: input, shape index: {}]   ;;  %s1714_s7 = inlined_call_operand.hbm [shape: f32[2,32,256], index: 7, kind: output, shape index: {}]  }
   0x1   :  { %14 = vsyncpa [#allocation7], 0 }
   0x2   :  { %15 = vsyncpa [#allocation5], 0  ;;  %s1375_s24 = smov [#allocation3]   ;;  %s1303_s28 = scalar_lea.hbm %s1707_s0, 2048 }
   0x3   :  { %s21_s25 = sshll.u32 %s1375_s24, 4  ;;  %p1304_p0 = scmp.ne.s32.totalorder %s1707_s0, %s1303_s28  ;;  %s22_s25 = int_to_ptr.vmem [resolvable:$true] %s21_s25 }
   0x4   :  { %p1307_p1 = scmp.lt.u32.totalorder %s1303_s28, %s1707_s0 }
   0x6   :  { %p1309_p2 = pnand %p1307_p1, %p1304_p0 }
   0x8   :  { %1312 = shalt.err (!%p1309_p2)
}
   0x9   :  { %s1313_s10 = scalar_lea.vmem %s22_s25, 2048  ;;  %p1318_p4 = scmp.lt.s32.totalorder %s22_s25, %s22_s25 }
   0xa   :  { %p1314_p3 = scmp.ne.s32.totalorder %s22_s25, %s1313_s10  ;;  %p1319_p5 = scmp.lt.s32.totalorder %s1313_s10, %s1313_s10 }
   0xc   :  { %p1320_p6 = por %p1319_p5, %p1318_p4 }
   0xe   :  { %p1321_p7 = pnand %p1320_p6, %p1314_p3 }
  0x10   :  { %1324 = shalt.err (!%p1321_p7)
}
  0x11   :  { %s1376_s11 = smov 256   ;;  %s1377_s12 = smov 16  }
  0x12   :  { %27 = dma.hbm_to_vmem [thread:$0]  %s1707_s0, 2048, %s22_s25, [#allocation4], %s1376_s11, %s1376_s11, %s1377_s12  }
  0x13   :  { %s1378_s15 = smov [#allocation6]   ;;  %s1325_s19 = scalar_lea.hbm %s1712_s5, 16384 }
  0x14   :  { %s41_s16 = sshll.u32 %s1378_s15, 4  ;;  %p1326_p8 = scmp.ne.s32.totalorder %s1712_s5, %s1325_s19  ;;  %s42_s16 = int_to_ptr.vmem [resolvable:$true] %s41_s16 }
  0x15   :  { %p1329_p9 = scmp.lt.u32.totalorder %s1325_s19, %s1712_s5 }
  0x17   :  { %p1331_p10 = pnand %p1329_p9, %p1326_p8 }
  0x19   :  { %1334 = shalt.err (!%p1331_p10)
}
  0x1a   :  { %s1335_s24 = scalar_lea.vmem %s42_s16, 16384  ;;  %p1340_p12 = scmp.lt.s32.totalorder %s42_s16, %s42_s16 }
  0x1b   :  { %p1336_p11 = scmp.ne.s32.totalorder %s42_s16, %s1335_s24  ;;  %p1341_p13 = scmp.lt.s32.totalorder %s1335_s24, %s1335_s24 }
  0x1d   :  { %p1342_p0 = por %p1341_p13, %p1340_p12 }
  0x1f   :  { %p1343_p1 = pnand %p1342_p0, %p1336_p11 }
  0x21   :  { %1346 = shalt.err (!%p1343_p1)
}
  0x22   :  { %47 = dma.hbm_to_vmem [thread:$0]  %s1712_s5, 16384, %s42_s16, [#allocation7], %s1376_s11, %s1376_s11, %s1377_s12  }
  0x23   :  { %1369 = dma.done.wait [#allocation4], 2048  }
  0x24   :  { %1370 = vsyncadd [#allocation4], 4294965248 }
  0x25   :  { %1371 = dma.done.wait [#allocation7], 16384  }
  0x26   :  { %1372 = vsyncadd [#allocation7], 4294950912  ;;  %v64_v0 = vld [vmem:[#allocation3 + $0x40] sm:$0xff]  ;;  %v65_v1 = vld [vmem:[#allocation3 + $0x48] sm:$0xff]  ;;  %v106_v24 = vlaneseq  ;;  %v1379_v31 = vmov 0   ;;  %vm369_vm0 = vcmask 130112  }
  0x27   :  { %v56_v2 = vld [vmem:[#allocation3] sm:$0xff]  ;;  %v84_v3 = vadd.f32 %v65_v1, %v64_v0  ;;  %v57_v4 = vld [vmem:[#allocation3 + $0x8] sm:$0xff]  ;;  %v66_v5 = vld [vmem:[#allocation3 + $0x50] sm:$0xff]  ;;  %1270 = vset.pattern.permute.xlu1 %v1379_v31  ;;  %1269 = vset.pattern.permute.xlu0 %v1379_v31  ;;  %vm376_vm1 = vcmask 195712   ;;  %vm383_vm2 = vcmask 261312   ;;  %vm518_vm3 = vcmask 1041409  }
  0x28   :  { %v67_v6 = vld [vmem:[#allocation3 + $0x58] sm:$0xff]  ;;  %v72_v7 = vadd.f32 %v57_v4, %v56_v2  ;;  %v58_v8 = vld [vmem:[#allocation3 + $0x10] sm:$0xff]  ;;  %v68_v12 = vld [vmem:[#allocation3 + $0x60] sm:$0xff]  ;;  %v1453_v25 = vshrl.u32 %v106_v24, 7  ;;  %vm520_vm4 = vcmask 1042434   ;;  %vm522_vm5 = vcmask 1043459  }
  0x29   :  { %v59_v9 = vld [vmem:[#allocation3 + $0x18] sm:$0xff]  ;;  %85 = vadd.xlane.f32.xlu1 %v84_v3  ;;  %v87_v10 = vadd.f32 %v67_v6, %v66_v5  ;;  %v69_v13 = vld [vmem:[#allocation3 + $0x68] sm:$0xff]  ;;  %v60_v14 = vld [vmem:[#allocation3 + $0x20] sm:$0xff]  ;;  %vm529_vm6 = vcmask 257024  }
  0x2a   :  { %73 = vadd.xlane.f32.xlu0 %v72_v7  ;;  %v75_v11 = vadd.f32 %v59_v9, %v58_v8  ;;  %v61_v15 = vld [vmem:[#allocation3 + $0x28] sm:$0xff]  ;;  %v90_v16 = vadd.f32 %v69_v13, %v68_v12  ;;  %v70_v18 = vld [vmem:[#allocation3 + $0x70] sm:$0xff]  ;;  %v71_v19 = vld [vmem:[#allocation3 + $0x78] sm:$0xff]  ;;  %v1456_v26 = vsub.s32 0, %v1453_v25  ;;  %v1463_v29 = vsub.s32 1, %v1453_v25 }
  0x2b   :  { %v78_v17 = vadd.f32 %v61_v15, %v60_v14  ;;  %v62_v20 = vld [vmem:[#allocation3 + $0x30] sm:$0xff]  ;;  %v63_v21 = vld [vmem:[#allocation3 + $0x38] sm:$0xff]  ;;  %v93_v22 = vadd.f32 %v71_v19, %v70_v18  ;;  %v104_v27 = vld [vmem:[%s1708_s1] sm:$0xf]  ;;  %v146_v32 = vsub.s32 2, %v1453_v25  ;;  %v165_v34 = vsub.s32 3, %v1453_v25 }
  0x2c   :  { %v81_v23 = vadd.f32 %v63_v21, %v62_v20  ;;  %v109_v28 = vrot.slane %v104_v27, %v1456_v26  ;;  %v128_v30 = vrot.slane %v104_v27, %v1463_v29 }
  0x2d   :  { %88 = vadd.xlane.f32.xlu1 %v87_v10  ;;  %v147_v33 = vrot.slane %v104_v27, %v146_v32  ;;  %v166_v35 = vrot.slane %v104_v27, %v165_v34 }
  0x2e   :  { %76 = vadd.xlane.f32.xlu0 %v75_v11 }
  0x31   :  { %91 = vadd.xlane.f32.xlu1 %v90_v16 }
  0x32   :  { %79 = vadd.xlane.f32.xlu0 %v78_v17 }
  0x35   :  { %94 = vadd.xlane.f32.xlu1 %v93_v22 }
  0x36   :  { %82 = vadd.xlane.f32.xlu0 %v81_v23 }
  0x46   :  { %115 = vbcast.lane.b32.xlu1 %v109_v28, 264 }
  0x4a   :  { %130 = vbcast.lane.b32.xlu1 %v128_v30, 256 }
  0x4c   :  { %111 = vbcast.lane.b32.xlu0 %v109_v28, 256 }
  0x4e   :  { %134 = vbcast.lane.b32.xlu1 %v128_v30, 264 }
  0x50   :  { %119 = vbcast.lane.b32.xlu0 %v109_v28, 272 }
  0x52   :  { %138 = vbcast.lane.b32.xlu1 %v128_v30, 272 }
  0x54   :  { %149 = vbcast.lane.b32.xlu0 %v147_v33, 256 }
  0x56   :  { %153 = vbcast.lane.b32.xlu1 %v147_v33, 264 }
  0x58   :  { %123 = vbcast.lane.b32.xlu0 %v109_v28, 280 }
  0x5a   :  { %142 = vbcast.lane.b32.xlu1 %v128_v30, 280 }
  0x5c   :  { %157 = vbcast.lane.b32.xlu0 %v147_v33, 272 }
  0x5e   :  { %168 = vbcast.lane.b32.xlu1 %v166_v35, 256 }
  0x60   :  { %172 = vbcast.lane.b32.xlu0 %v166_v35, 264 }
  0x62   :  { %161 = vbcast.lane.b32.xlu1 %v147_v33, 280 }
  0x64   :  { %176 = vbcast.lane.b32.xlu0 %v166_v35, 272 }
  0x66   :  { %180 = vbcast.lane.b32.xlu1 %v166_v35, 280 }
  0xb6   :  { %v86_v36 = vpop.xlane.xlu1 %85 }
  0xb7   :  { %v74_v37 = vpop.xlane.xlu0 %73  ;;  %v100_v52 = vmul.f32 0.00390625, %v86_v36 }
  0xb8   :  { %v96_v45 = vmul.f32 0.00390625, %v74_v37 }
  0xba   :  { %v89_v38 = vpop.xlane.xlu1 %88 }
  0xbb   :  { %v77_v39 = vpop.xlane.xlu0 %76  ;;  %v101_v56 = vmul.f32 0.00390625, %v89_v38 }
  0xbc   :  { %v97_v44 = vmul.f32 0.00390625, %v77_v39 }
  0xbe   :  { %v92_v40 = vpop.xlane.xlu1 %91 }
  0xbf   :  { %v80_v41 = vpop.xlane.xlu0 %79  ;;  %v102_v4 = vmul.f32 0.00390625, %v92_v40 }
  0xc0   :  { %v98_v60 = vmul.f32 0.00390625, %v80_v41 }
  0xc2   :  { %v95_v42 = vpop.xlane.xlu1 %94 }
  0xc3   :  { %v83_v43 = vpop.xlane.xlu0 %82  ;;  %v103_v21 = vmul.f32 0.00390625, %v95_v42 }
  0xc4   :  { %v99_v10 = vmul.f32 0.00390625, %v83_v43 }
  0xc6   :  { %v116_v46 = vpop.permute.xlu1 %115 }
  0xc7   :  { %v199_v47 = vmul.f32 %v116_v46, %v97_v44  ;;  %v112_v48 = vpop.permute.xlu0 %111  ;;  %v215_v58 = vmul.f32 %v116_v46, %v101_v56 }
  0xc8   :  { %v198_v49 = vmul.f32 %v112_v48, %v96_v45  ;;  %v214_v54 = vmul.f32 %v112_v48, %v100_v52 }
  0xc9   :  { %266 = vperm.xlu1 %1270, %v199_v47  }
  0xca   :  { %263 = vperm.xlu0 %1269, %v198_v49   ;;  %v131_v50 = vpop.permute.xlu1 %130 }
  0xcb   :  { %v202_v51 = vmul.f32 %v131_v50, %v96_v45  ;;  %v120_v57 = vpop.permute.xlu0 %119  ;;  %v218_v59 = vmul.f32 %v131_v50, %v100_v52 }
  0xcc   :  { %v200_v62 = vmul.f32 %v120_v57, %v98_v60  ;;  %v216_v5 = vmul.f32 %v120_v57, %v102_v4 }
  0xcd   :  { %275 = vperm.xlu1 %1270, %v202_v51  }
  0xce   :  { %v135_v53 = vpop.permute.xlu1 %134 }
  0xcf   :  { %v203_v55 = vmul.f32 %v135_v53, %v97_v44  ;;  %v219_v63 = vmul.f32 %v135_v53, %v101_v56  ;;  %v150_v0 = vpop.permute.xlu0 %149 }
  0xd0   :  { %v206_v1 = vmul.f32 %v150_v0, %v96_v45  ;;  %v222_v8 = vmul.f32 %v150_v0, %v100_v52 }
  0xd1   :  { %311 = vperm.xlu1 %1270, %v214_v54   ;;  %278 = vperm.xlu0 %1269, %v203_v55  }
  0xd2   :  { %v139_v61 = vpop.permute.xlu1 %138 }
  0xd3   :  { %v204_v2 = vmul.f32 %v139_v61, %v98_v60  ;;  %v124_v7 = vpop.permute.xlu0 %123  ;;  %v220_v9 = vmul.f32 %v139_v61, %v102_v4 }
  0xd4   :  { %v201_v13 = vmul.f32 %v124_v7, %v99_v10  ;;  %v217_v22 = vmul.f32 %v124_v7, %v103_v21 }
  0xd5   :  { %323 = vperm.xlu1 %1270, %v218_v59   ;;  %314 = vperm.xlu0 %1269, %v215_v58   ;;  %v359_v59 = vand.u32 127, %v106_v24 }
  0xd6   :  { %v154_v3 = vpop.permute.xlu1 %153 }
  0xd7   :  { %v207_v6 = vmul.f32 %v154_v3, %v97_v44  ;;  %v158_v11 = vpop.permute.xlu0 %157  ;;  %v223_v14 = vmul.f32 %v154_v3, %v101_v56  ;;  %v1493_v3 = vsub.s32 %v359_v59, %v1453_v25  ;;  %v378_v24 = vadd.s32 4294967272, %v359_v59 }
  0xd8   :  { %v208_v15 = vmul.f32 %v158_v11, %v98_v60  ;;  %v224_v27 = vmul.f32 %v158_v11, %v102_v4 }
  0xd9   :  { %326 = vperm.xlu0 %1269, %v219_v63   ;;  %269 = vperm.xlu1 %1270, %v200_v62   ;;  %v364_v62 = vadd.s32 4294967288, %v359_v59  ;;  %v371_v63 = vadd.s32 4294967280, %v359_v59 }
  0xda   :  { %v143_v12 = vpop.permute.xlu1 %142 }
  0xdb   :  { %v205_v16 = vmul.f32 %v143_v12, %v99_v10  ;;  %v173_v17 = vpop.permute.xlu0 %172  ;;  %v221_v23 = vmul.f32 %v143_v12, %v103_v21 }
  0xdc   :  { %v211_v19 = vmul.f32 %v173_v17, %v97_v44  ;;  %v227_v31 = vmul.f32 %v173_v17, %v101_v56 }
  0xdd   :  { %281 = vperm.xlu0 %1269, %v204_v2   ;;  %287 = vperm.xlu1 %1270, %v206_v1   ;;  %v1490_v2 = vsub.s32 %v364_v62, %v1453_v25 }
  0xde   :  { %v169_v18 = vpop.permute.xlu1 %168 }
  0xdf   :  { %v210_v20 = vmul.f32 %v169_v18, %v96_v45  ;;  %v226_v28 = vmul.f32 %v169_v18, %v100_v52  ;;  %v177_v33 = vpop.permute.xlu0 %176 }
  0xe0   :  { %v212_v34 = vmul.f32 %v177_v33, %v98_v60  ;;  %v228_v37 = vmul.f32 %v177_v33, %v102_v4  ;;  %v1496_v4 = vsub.s32 %v371_v63, %v1453_v25 }
  0xe1   :  { %290 = vperm.xlu0 %1269, %v207_v6   ;;  %317 = vperm.xlu1 %1270, %v216_v5  }
  0xe2   :  { %v162_v30 = vpop.permute.xlu1 %161 }
  0xe3   :  { %v209_v32 = vmul.f32 %v162_v30, %v99_v10  ;;  %v225_v35 = vmul.f32 %v162_v30, %v103_v21 }
  0xe5   :  { %329 = vperm.xlu0 %1269, %v220_v9   ;;  %335 = vperm.xlu1 %1270, %v222_v8  }
  0xe6   :  { %v181_v36 = vpop.permute.xlu1 %180 }
  0xe7   :  { %v213_v38 = vmul.f32 %v181_v36, %v99_v10  ;;  %v229_v39 = vmul.f32 %v181_v36, %v103_v21 }
  0xe9   :  { %338 = vperm.xlu0 %1269, %v223_v14   ;;  %272 = vperm.xlu1 %1270, %v201_v13   ;;  %v1510_v14 = vsub.s32 %v378_v24, %v1453_v25 }
  0xed   :  { %284 = vperm.xlu0 %1269, %v205_v16   ;;  %293 = vperm.xlu1 %1270, %v208_v15  }
  0xf1   :  { %299 = vperm.xlu0 %1269, %v210_v20   ;;  %302 = vperm.xlu1 %1270, %v211_v19  }
  0xf5   :  { %320 = vperm.xlu0 %1269, %v217_v22   ;;  %332 = vperm.xlu1 %1270, %v221_v23  }
  0xf9   :  { %341 = vperm.xlu0 %1269, %v224_v27   ;;  %347 = vperm.xlu1 %1270, %v226_v28  }
  0xfd   :  { %350 = vperm.xlu0 %1269, %v227_v31   ;;  %296 = vperm.xlu1 %1270, %v209_v32  }
 0x101   :  { %344 = vperm.xlu1 %1270, %v225_v35   ;;  %305 = vperm.xlu0 %1269, %v212_v34  }
 0x105   :  { %308 = vperm.xlu1 %1270, %v213_v38   ;;  %353 = vperm.xlu0 %1269, %v228_v37  }
 0x109   :  { %356 = vperm.xlu0 %1269, %v229_v39  }
 0x148   :  { %v267_v40 = vpop.permute.xlu1 %266 }
 0x149   :  { %v264_v41 = vpop.permute.xlu0 %263  ;;  %v368_v7 = vrot.slane %v267_v40, %v1490_v2 }
 0x14a   :  { %v363_v8 = vrot.slane %v264_v41, %v1493_v3 }
 0x14c   :  { %v276_v42 = vpop.permute.xlu1 %275  ;;  %v370_v20 = vsel %vm369_vm0, %v368_v7, %v363_v8 }
 0x14d   :  { %v388_v13 = vrot.slane %v276_v42, %v1493_v3 }
 0x150   :  { %v312_v43 = vpop.permute.xlu1 %311  ;;  %v279_v44 = vpop.permute.xlu0 %278 }
 0x151   :  { %v392_v9 = vrot.slane %v279_v44, %v1490_v2  ;;  %v445_v15 = vrot.slane %v312_v43, %v1493_v3 }
 0x153   :  { %v393_v21 = vsel %vm369_vm0, %v392_v9, %v388_v13 }
 0x154   :  { %v324_v45 = vpop.permute.xlu1 %323  ;;  %v315_v46 = vpop.permute.xlu0 %314 }
 0x155   :  { %v449_v10 = vrot.slane %v315_v46, %v1490_v2  ;;  %v464_v16 = vrot.slane %v324_v45, %v1493_v3 }
 0x157   :  { %v450_v23 = vsel %vm369_vm0, %v449_v10, %v445_v15 }
 0x158   :  { %v270_v47 = vpop.permute.xlu1 %269  ;;  %v327_v48 = vpop.permute.xlu0 %326 }
 0x159   :  { %v375_v11 = vrot.slane %v270_v47, %v1496_v4  ;;  %v468_v12 = vrot.slane %v327_v48, %v1490_v2 }
 0x15b   :  { %v377_v27 = vsel %vm376_vm1, %v375_v11, %v370_v20  ;;  %v469_v28 = vsel %vm369_vm0, %v468_v12, %v464_v16 }
 0x15c   :  { %v288_v49 = vpop.permute.xlu1 %287  ;;  %v282_v50 = vpop.permute.xlu0 %281 }
 0x15d   :  { %v397_v17 = vrot.slane %v282_v50, %v1496_v4  ;;  %v407_v31 = vrot.slane %v288_v49, %v1493_v3 }
 0x15f   :  { %v398_v35 = vsel %vm376_vm1, %v397_v17, %v393_v21 }
 0x160   :  { %v1468_v51 = vpop.permute.xlu1 %317  ;;  %v291_v52 = vpop.permute.xlu0 %290 }
 0x161   :  { %v411_v22 = vrot.slane %v291_v52, %v1490_v2  ;;  %v454_v32 = vrot.slane %v1468_v51, %v1496_v4 }
 0x163   :  { %v412_v41 = vsel %vm369_vm0, %v411_v22, %v407_v31  ;;  %v455_v49 = vsel %vm376_vm1, %v454_v32, %v450_v23  ;;  %v731_v31 = vld [vmem:[#allocation6 + $0x18] sm:$0xff]  ;;  %v728_v32 = vld [vmem:[#allocation6] sm:$0xff] }
 0x164   :  { %v1470_v53 = vpop.permute.xlu1 %335  ;;  %v1472_v54 = vpop.permute.xlu0 %329 }
 0x165   :  { %v473_v33 = vrot.slane %v1472_v54, %v1496_v4  ;;  %v483_v42 = vrot.slane %v1470_v53, %v1493_v3 }
 0x167   :  { %v474_v50 = vsel %vm376_vm1, %v473_v33, %v469_v28 }
 0x168   :  { %v1474_v55 = vpop.permute.xlu1 %272  ;;  %v1476_v56 = vpop.permute.xlu0 %338 }
 0x169   :  { %v382_v36 = vrot.slane %v1474_v55, %v1510_v14  ;;  %v487_v37 = vrot.slane %v1476_v56, %v1490_v2 }
 0x16b   :  { %v384_v53 = vsel %vm383_vm2, %v382_v36, %v377_v27  ;;  %v488_v54 = vsel %vm369_vm0, %v487_v37, %v483_v42  ;;  %v796_v36 = vld [vmem:[#allocation6 + $0x218] sm:$0xff] }
 0x16c   :  { %v1478_v57 = vpop.permute.xlu1 %293  ;;  %v285_v58 = vpop.permute.xlu0 %284 }
 0x16d   :  { %v402_v30 = vrot.slane %v285_v58, %v1510_v14  ;;  %v416_v34 = vrot.slane %v1478_v57, %v1496_v4 }
 0x16f   :  { %v403_v45 = vsel %vm383_vm2, %v402_v30, %v398_v35  ;;  %v417_v51 = vsel %vm376_vm1, %v416_v34, %v412_v41  ;;  %v729_v30 = vld [vmem:[#allocation6 + $0x8] sm:$0xff]  ;;  %v730_v34 = vld [vmem:[#allocation6 + $0x10] sm:$0xff] }
 0x170   :  { %v1481_v60 = vpop.permute.xlu1 %302  ;;  %v1483_v61 = vpop.permute.xlu0 %299  ;;  %v519_v62 = vsel %vm518_vm3, %v403_v45, %v384_v53  ;;  %v1196_v33 = vpack.c.bf16 %v731_v31, %v729_v30  ;;  %v794_v35 = vld [vmem:[#allocation6 + $0x208] sm:$0xff]  ;;  %v1198_v37 = vpack.c.bf16 %v730_v34, %v728_v32  ;;  %v734_v45 = vld [vmem:[#allocation6 + $0x30] sm:$0xff]  ;;  %v816_v30 = vld [vmem:[#allocation6 + $0x2b8] sm:$0xff] }
 0x171   :  { %v430_v43 = vrot.slane %v1481_v60, %v1490_v2  ;;  %v426_v44 = vrot.slane %v1483_v61, %v1493_v3  ;;  %v733_v41 = vld [vmem:[#allocation6 + $0x28] sm:$0xff]  ;;  %v748_v34 = vld [vmem:[#allocation6 + $0xa0] sm:$0xff] }
 0x172   :  { %1197 = vmatprep.subr.bf16.mxu0 %v1196_v33  ;;  %v737_v53 = vld [vmem:[#allocation6 + $0x48] sm:$0xff] }
 0x173   :  { %v431_v59 = vsel %vm369_vm0, %v430_v43, %v426_v44  ;;  %v735_v43 = vld [vmem:[#allocation6 + $0x38] sm:$0xff]  ;;  %v732_v44 = vld [vmem:[#allocation6 + $0x20] sm:$0xff]  ;;  %1199 = vmatpush1.bf16.msra.mxu0 %v1198_v37 }
 0x174   :  { %v1485_v0 = vpop.permute.xlu1 %332  ;;  %v1487_v1 = vpop.permute.xlu0 %320 }
 0x175   :  { %v478_v46 = vrot.slane %v1485_v0, %v1510_v14  ;;  %v459_v47 = vrot.slane %v1487_v1, %v1510_v14 }
 0x177   :  { %v479_v63 = vsel %vm383_vm2, %v478_v46, %v474_v50  ;;  %v460_v0 = vsel %vm383_vm2, %v459_v47, %v455_v49  ;;  %v1200_v46 = vpack.c.bf16 %v735_v43, %v733_v41  ;;  %v1202_v47 = vpack.c.bf16 %v734_v45, %v732_v44  ;;  %v800_v49 = vld [vmem:[#allocation6 + $0x238] sm:$0xff]  ;;  %v797_v50 = vld [vmem:[#allocation6 + $0x220] sm:$0xff]  ;;  %v818_v41 = vld [vmem:[#allocation6 + $0x2c8] sm:$0xff] }
 0x178   :  { %v1498_v5 = vpop.permute.xlu1 %347  ;;  %v1500_v6 = vpop.permute.xlu0 %341 }
 0x179   :  { %v492_v52 = vrot.slane %v1500_v6, %v1496_v4  ;;  %v502_v6 = vrot.slane %v1498_v5, %v1493_v3  ;;  %v524_v3 = vsel %vm518_vm3, %v479_v63, %v460_v0  ;;  %1201 = vmatprep.subr.bf16.mxu0 %v1200_v46  ;;  %v752_v46 = vld [vmem:[#allocation6 + $0xc0] sm:$0xff] }
 0x17a   :  { %1203 = vmatpush1.bf16.msra.mxu0 %v1202_v47  ;;  %v754_v47 = vld [vmem:[#allocation6 + $0xd0] sm:$0xff] }
 0x17b   :  { %v493_v7 = vsel %vm376_vm1, %v492_v52, %v488_v54  ;;  %v799_v52 = vld [vmem:[#allocation6 + $0x230] sm:$0xff]  ;;  %v739_v54 = vld [vmem:[#allocation6 + $0x58] sm:$0xff] }
 0x17c   :  { %v297_v18 = vpop.permute.xlu1 %296  ;;  %v351_v19 = vpop.permute.xlu0 %350 }
 0x17d   :  { %v421_v38 = vrot.slane %v297_v18, %v1510_v14  ;;  %v506_v60 = vrot.slane %v351_v19, %v1490_v2 }
 0x17f   :  { %v422_v55 = vsel %vm383_vm2, %v421_v38, %v417_v51  ;;  %v507_v12 = vsel %vm369_vm0, %v506_v60, %v502_v6  ;;  %v1132_v38 = vpack.c.bf16 %v796_v36, %v794_v35  ;;  %v804_v60 = vld [vmem:[#allocation6 + $0x258] sm:$0xff]  ;;  %v740_v6 = vld [vmem:[#allocation6 + $0x60] sm:$0xff]  ;;  %v750_v35 = vld [vmem:[#allocation6 + $0xb0] sm:$0xff] }
 0x180   :  { %v345_v39 = vpop.permute.xlu1 %344  ;;  %v306_v40 = vpop.permute.xlu0 %305  ;;  %v521_v2 = vsel %vm520_vm4, %v422_v55, %v519_v62  ;;  %v1138_v55 = vpack.c.bf16 %v799_v52, %v797_v50  ;;  %v803_v62 = vld [vmem:[#allocation6 + $0x250] sm:$0xff]  ;;  %v813_v36 = vld [vmem:[#allocation6 + $0x2a0] sm:$0xff]  ;;  %v1218_v43 = vpack.c.bf16 %v750_v35, %v748_v34  ;;  %v759_v52 = vld [vmem:[#allocation6 + $0xf8] sm:$0xff] }
 0x181   :  { %v435_v48 = vrot.slane %v306_v40, %v1496_v4  ;;  %v497_v56 = vrot.slane %v345_v39, %v1510_v14  ;;  %v793_v39 = vld [vmem:[#allocation6 + $0x200] sm:$0xff]  ;;  %v795_v40 = vld [vmem:[#allocation6 + $0x210] sm:$0xff]  ;;  %1133 = vmatprep.subr.bf16.mxu1 %v1132_v38 }
 0x182   :  { %v1134_v42 = vpack.c.bf16 %v795_v40, %v793_v39  ;;  %v815_v38 = vld [vmem:[#allocation6 + $0x2b0] sm:$0xff]  ;;  %v753_v39 = vld [vmem:[#allocation6 + $0xc8] sm:$0xff]  ;;  %v755_v40 = vld [vmem:[#allocation6 + $0xd8] sm:$0xff] }
 0x183   :  { %v436_v1 = vsel %vm376_vm1, %v435_v48, %v431_v59  ;;  %v498_v9 = vsel %vm383_vm2, %v497_v56, %v493_v7  ;;  %v798_v48 = vld [vmem:[#allocation6 + $0x228] sm:$0xff]  ;;  %v1204_v56 = vpack.c.bf16 %v739_v54, %v737_v53  ;;  %v1154_v44 = vpack.c.bf16 %v815_v38, %v813_v36  ;;  %v819_v50 = vld [vmem:[#allocation6 + $0x2d0] sm:$0xff]  ;;  %v824_v54 = vld [vmem:[#allocation6 + $0x2f8] sm:$0xff] }
 0x184   :  { %v309_v57 = vpop.permute.xlu1 %308  ;;  %v354_v58 = vpop.permute.xlu0 %353  ;;  %v525_v16 = vsel %vm520_vm4, %v498_v9, %v524_v3  ;;  %1135 = vmatpush1.bf16.msra.mxu1 %v1134_v42  ;;  %v1136_v51 = vpack.c.bf16 %v800_v49, %v798_v48  ;;  %v802_v59 = vld [vmem:[#allocation6 + $0x248] sm:$0xff]  ;;  %v820_v42 = vld [vmem:[#allocation6 + $0x2d8] sm:$0xff]  ;;  %v1220_v45 = vpack.c.bf16 %v755_v40, %v753_v39  ;;  %v817_v48 = vld [vmem:[#allocation6 + $0x2c0] sm:$0xff] }
 0x185   :  { %v440_v61 = vrot.slane %v309_v57, %v1510_v14  ;;  %v511_v24 = vrot.slane %v354_v58, %v1496_v4  ;;  %v736_v57 = vld [vmem:[#allocation6 + $0x40] sm:$0xff]  ;;  %v738_v58 = vld [vmem:[#allocation6 + $0x50] sm:$0xff]  ;;  %v1140_v0 = vpack.c.bf16 %v804_v60, %v802_v59  ;;  %1205 = vmatprep.subr.bf16.mxu0 %v1204_v56  ;;  %v806_v9 = vld [vmem:[#allocation6 + $0x268] sm:$0xff]  ;;  %v1156_v49 = vpack.c.bf16 %v820_v42, %v818_v41 }
 0x186   :  { %1137 = vmatprep.subr.bf16.mxu1 %v1136_v51  ;;  %v1206_v63 = vpack.c.bf16 %v738_v58, %v736_v57  ;;  %v757_v51 = vld [vmem:[#allocation6 + $0xe8] sm:$0xff]  ;;  %v1158_v56 = vpack.c.bf16 %v819_v50, %v817_v48  ;;  %v756_v58 = vld [vmem:[#allocation6 + $0xe0] sm:$0xff]  ;;  %v758_v59 = vld [vmem:[#allocation6 + $0xf0] sm:$0xff] }
 0x187   :  { %v441_v8 = vsel %vm383_vm2, %v440_v61, %v436_v1  ;;  %v512_v15 = vsel %vm376_vm1, %v511_v24, %v507_v12  ;;  %v801_v61 = vld [vmem:[#allocation6 + $0x240] sm:$0xff]  ;;  %v741_v1 = vld [vmem:[#allocation6 + $0x68] sm:$0xff]  ;;  %v743_v24 = vld [vmem:[#allocation6 + $0x78] sm:$0xff]  ;;  %v1224_v57 = vpack.c.bf16 %v759_v52, %v757_v51 }
 0x188   :  { %v357_v10 = vpop.permute.xlu0 %356  ;;  %v523_v11 = vsel %vm522_vm5, %v441_v8, %v521_v2  ;;  %1139 = vmatpush1.bf16.msra.mxu1 %v1138_v55  ;;  %v1142_v7 = vpack.c.bf16 %v803_v62, %v801_v61  ;;  %v1208_v8 = vpack.c.bf16 %v743_v24, %v741_v1  ;;  %v742_v2 = vld [vmem:[#allocation6 + $0x70] sm:$0xff]  ;;  %v805_v12 = vld [vmem:[#allocation6 + $0x260] sm:$0xff]  ;;  %1207 = vmatpush1.bf16.msra.mxu0 %v1206_v63  ;;  %v822_v53 = vld [vmem:[#allocation6 + $0x2e8] sm:$0xff] }
 0x189   :  { %v516_v13 = vrot.slane %v357_v10, %v1510_v14  ;;  %v530_v4 = vsel %vm529_vm6, %v523_v11, 0.0  ;;  %v1126_v14 = vld [vmem:[%s1709_s2] ss:$0 sm:$0xff]  ;;  %v808_v10 = vld [vmem:[#allocation6 + $0x278] sm:$0xff]  ;;  %1141 = vmatprep.subr.bf16.mxu1 %v1140_v0  ;;  %v1210_v3 = vpack.c.bf16 %v742_v2, %v740_v6  ;;  %v1222_v55 = vpack.c.bf16 %v754_v47, %v752_v46  ;;  %v823_v62 = vld [vmem:[#allocation6 + $0x2f0] sm:$0xff] }
 0x18a   :  { %531 = vadd.xlane.f32.xlu1 %v530_v4  ;;  %v1144_v11 = vpack.c.bf16 %v808_v10, %v806_v9  ;;  %v745_v4 = vld [vmem:[#allocation6 + $0x88] sm:$0xff]  ;;  %1209 = vmatprep.subr.bf16.mxu0 %v1208_v8  ;;  %v821_v60 = vld [vmem:[#allocation6 + $0x2e0] sm:$0xff]  ;;  %v1160_v61 = vpack.c.bf16 %v824_v54, %v822_v53  ;;  %v763_v0 = vld [vmem:[#allocation6 + $0x118] sm:$0xff]  ;;  %v1226_v1 = vpack.c.bf16 %v758_v59, %v756_v58 }
 0x18b   :  { %v517_v5 = vsel %vm383_vm2, %v516_v13, %v512_v15  ;;  %v807_v13 = vld [vmem:[#allocation6 + $0x270] sm:$0xff]  ;;  %v747_v15 = vld [vmem:[#allocation6 + $0x98] sm:$0xff]  ;;  %v761_v63 = vld [vmem:[#allocation6 + $0x108] sm:$0xff]  ;;  %v1162_v24 = vpack.c.bf16 %v823_v62, %v821_v60 }
 0x18c   :  { %v526_v17 = vsel %vm522_vm5, %v517_v5, %v525_v16  ;;  %v810_v5 = vld [vmem:[#allocation6 + $0x288] sm:$0xff]  ;;  %v812_v16 = vld [vmem:[#allocation6 + $0x298] sm:$0xff]  ;;  %1143 = vmatpush1.bf16.msra.mxu1 %v1142_v7  ;;  %1211 = vmatpush1.bf16.msra.mxu0 %v1210_v3  ;;  %v1228_v6 = vpack.c.bf16 %v763_v0, %v761_v63  ;;  %v760_v7 = vld [vmem:[#allocation6 + $0x100] sm:$0xff] }
 0x18d   :  { %v533_v18 = vsel %vm529_vm6, %v526_v17, 0.0  ;;  %v1146_v17 = vpack.c.bf16 %v807_v13, %v805_v12  ;;  %1145 = vmatprep.subr.bf16.mxu1 %v1144_v11  ;;  %v762_v8 = vld [vmem:[#allocation6 + $0x110] sm:$0xff]  ;;  %v550_v9 = vld [vmem:[%s1710_s3] sm:$0xf]  ;;  %v826_v36 = vld [vmem:[#allocation6 + $0x308] sm:$0xff] }
 0x18e   :  { %534 = vadd.xlane.f32.xlu0 %v533_v18  ;;  %v1212_v18 = vpack.c.bf16 %v747_v15, %v745_v4  ;;  %v1230_v2 = vpack.c.bf16 %v762_v8, %v760_v7  ;;  %v825_v39 = vld [vmem:[#allocation6 + $0x300] sm:$0xff]  ;;  %v827_v40 = vld [vmem:[#allocation6 + $0x310] sm:$0xff]  ;;  %v765_v42 = vld [vmem:[#allocation6 + $0x128] sm:$0xff] }
 0x18f   :  { %v1166_v41 = vpack.c.bf16 %v827_v40, %v825_v39  ;;  %v764_v46 = vld [vmem:[#allocation6 + $0x120] sm:$0xff]  ;;  %v766_v47 = vld [vmem:[#allocation6 + $0x130] sm:$0xff]  ;;  %v830_v50 = vld [vmem:[#allocation6 + $0x328] sm:$0xff] }
 0x190   :  { %1147 = vmatpush1.bf16.msra.mxu1 %v1146_v17  ;;  %1213 = vmatprep.subr.bf16.mxu0 %v1212_v18  ;;  %v832_v51 = vld [vmem:[#allocation6 + $0x338] sm:$0xff]  ;;  %v829_v53 = vld [vmem:[#allocation6 + $0x320] sm:$0xff]  ;;  %v831_v54 = vld [vmem:[#allocation6 + $0x330] sm:$0xff] }
 0x191   :  { %v1168_v52 = vpack.c.bf16 %v832_v51, %v830_v50  ;;  %v768_v59 = vld [vmem:[#allocation6 + $0x140] sm:$0xff]  ;;  %v770_v60 = vld [vmem:[#allocation6 + $0x150] sm:$0xff]  ;;  %v834_v62 = vld [vmem:[#allocation6 + $0x348] sm:$0xff] }
 0x192   :  { %v836_v63 = vld [vmem:[#allocation6 + $0x358] sm:$0xff]  ;;  %v773_v7 = vld [vmem:[#allocation6 + $0x168] sm:$0xff]  ;;  %v782_v39 = vld [vmem:[#allocation6 + $0x1b0] sm:$0xff] }
 0x193   :  { %v1172_v0 = vpack.c.bf16 %v836_v63, %v834_v62  ;;  %v775_v8 = vld [vmem:[#allocation6 + $0x178] sm:$0xff]  ;;  %v784_v50 = vld [vmem:[#allocation6 + $0x1c0] sm:$0xff]  ;;  %v786_v51 = vld [vmem:[#allocation6 + $0x1d0] sm:$0xff] }
 0x194   :  { %v790_v63 = vld [vmem:[#allocation6 + $0x1f0] sm:$0xff] }
 0x1a4   :  { %543 = vbcast.lane.b32.xlu0 %v1126_v14, 256  ;;  %v744_v14 = vld [vmem:[#allocation6 + $0x80] sm:$0xff] }
 0x217   :  { %v532_v20 = vpop.xlane.xlu1 %531 }
 0x21b   :  { %v535_v19 = vpop.xlane.xlu0 %534 }
 0x21f   :  { %v544_v21 = vpop.permute.xlu0 %543 }
 0x220   :  { %v546_v22 = vadd.f32 %v544_v21, %v532_v20  ;;  %v547_v23 = vadd.f32 %v544_v21, %v535_v19  ;;  %v746_v19 = vld [vmem:[#allocation6 + $0x90] sm:$0xff]  ;;  %v809_v20 = vld [vmem:[#allocation6 + $0x280] sm:$0xff]  ;;  %v1148_v21 = vpack.c.bf16 %v812_v16, %v810_v5 }
 0x221   :  { %v1214_v31 = vpack.c.bf16 %v746_v19, %v744_v14 }
 0x222   :  { %v548_v27 = vmax.f32 %v546_v22, 0.0  ;;  %v549_v28 = vmax.f32 %v547_v23, 0.0  ;;  %v811_v22 = vld [vmem:[#allocation6 + $0x290] sm:$0xff]  ;;  %v749_v23 = vld [vmem:[#allocation6 + $0xa8] sm:$0xff]  ;;  %1149 = vmatprep.subr.bf16.mxu1 %v1148_v21  ;;  %v1127_v21 = vld [vmem:[%s1711_s4] ss:$0 sm:$0xff] }
 0x223   :  { %v1150_v32 = vpack.c.bf16 %v811_v22, %v809_v20  ;;  %1215 = vmatpush1.bf16.msra.mxu0 %v1214_v31 }
 0x224   :  { %553 = vperm.xlu1 %1270, %v548_v27   ;;  %v751_v27 = vld [vmem:[#allocation6 + $0xb8] sm:$0xff] }
 0x225   :  { %v1216_v33 = vpack.c.bf16 %v751_v27, %v749_v23  ;;  %1151 = vmatpush1.bf16.msra.mxu1 %v1150_v32 }
 0x227   :  { %1217 = vmatprep.subr.bf16.mxu0 %v1216_v33 }
 0x228   :  { %558 = vperm.xlu1 %1270, %v549_v28   ;;  %v814_v28 = vld [vmem:[#allocation6 + $0x2a8] sm:$0xff]  ;;  %1219 = vmatpush1.bf16.msra.mxu0 %v1218_v43  ;;  %v767_v43 = vld [vmem:[#allocation6 + $0x138] sm:$0xff] }
 0x229   :  { %v1152_v37 = vpack.c.bf16 %v816_v30, %v814_v28  ;;  %1221 = vmatprep.subr.bf16.mxu0 %v1220_v45  ;;  %v1232_v45 = vpack.c.bf16 %v767_v43, %v765_v42  ;;  %v848_v42 = vld [vmem:[#allocation6 + $0x3b8] sm:$0xff] }
 0x22b   :  { %1153 = vmatprep.subr.bf16.mxu1 %v1152_v37  ;;  %v828_v37 = vld [vmem:[#allocation6 + $0x318] sm:$0xff] }
 0x22c   :  { %1155 = vmatpush1.bf16.msra.mxu1 %v1154_v44  ;;  %1223 = vmatpush1.bf16.msra.mxu0 %v1222_v55  ;;  %v1164_v38 = vpack.c.bf16 %v828_v37, %v826_v36  ;;  %v1170_v55 = vpack.c.bf16 %v831_v54, %v829_v53  ;;  %v783_v36 = vld [vmem:[#allocation6 + $0x1b8] sm:$0xff]  ;;  %v1254_v53 = vpack.c.bf16 %v786_v51, %v784_v50 }
 0x22d   :  { %1157 = vmatprep.subr.bf16.mxu1 %v1156_v49  ;;  %1225 = vmatprep.subr.bf16.mxu0 %v1224_v57  ;;  %v1234_v49 = vpack.c.bf16 %v766_v47, %v764_v46  ;;  %v771_v57 = vld [vmem:[#allocation6 + $0x158] sm:$0xff]  ;;  %v785_v47 = vld [vmem:[#allocation6 + $0x1c8] sm:$0xff] }
 0x22e   :  { %v852_v54 = vld [vmem:[#allocation6 + $0x3d8] sm:$0xff] }
 0x230   :  { %1159 = vmatpush1.bf16.msra.mxu1 %v1158_v56  ;;  %1227 = vmatpush1.bf16.msra.mxu0 %v1226_v1  ;;  %v769_v56 = vld [vmem:[#allocation6 + $0x148] sm:$0xff]  ;;  %v833_v1 = vld [vmem:[#allocation6 + $0x340] sm:$0xff] }
 0x231   :  { %1161 = vmatprep.subr.bf16.mxu1 %v1160_v61  ;;  %1229 = vmatprep.subr.bf16.mxu0 %v1228_v6  ;;  %v1236_v58 = vpack.c.bf16 %v771_v57, %v769_v56  ;;  %v1238_v61 = vpack.c.bf16 %v770_v60, %v768_v59  ;;  %v851_v56 = vld [vmem:[#allocation6 + $0x3d0] sm:$0xff]  ;;  %v789_v59 = vld [vmem:[#allocation6 + $0x1e8] sm:$0xff]  ;;  %v791_v60 = vld [vmem:[#allocation6 + $0x1f8] sm:$0xff] }
 0x232   :  { %v1256_v62 = vpack.c.bf16 %v791_v60, %v789_v59  ;;  %v1302_v60 = vld [vmem:[#allocation3 + $0x78] sm:$0xff] }
 0x234   :  { %1163 = vmatpush1.bf16.msra.mxu1 %v1162_v24  ;;  %1231 = vmatpush1.bf16.msra.mxu0 %v1230_v2  ;;  %v835_v24 = vld [vmem:[#allocation6 + $0x350] sm:$0xff]  ;;  %v1240_v2 = vpack.c.bf16 %v775_v8, %v773_v7  ;;  %v853_v7 = vld [vmem:[#allocation6 + $0x3e0] sm:$0xff] }
 0x235   :  { %1165 = vmatprep.subr.bf16.mxu1 %v1164_v38  ;;  %1233 = vmatprep.subr.bf16.mxu0 %v1232_v45  ;;  %v1174_v6 = vpack.c.bf16 %v835_v24, %v833_v1  ;;  %v780_v38 = vld [vmem:[#allocation6 + $0x1a0] sm:$0xff]  ;;  %v847_v45 = vld [vmem:[#allocation6 + $0x3b0] sm:$0xff]  ;;  %v856_v1 = vld [vmem:[#allocation6 + $0x3f8] sm:$0xff] }
 0x236   :  { %v1250_v40 = vpack.c.bf16 %v782_v39, %v780_v38  ;;  %v855_v8 = vld [vmem:[#allocation6 + $0x3f0] sm:$0xff] }
 0x238   :  { %1167 = vmatpush1.bf16.msra.mxu1 %v1166_v41  ;;  %1235 = vmatpush1.bf16.msra.mxu0 %v1234_v49  ;;  %v846_v41 = vld [vmem:[#allocation6 + $0x3a8] sm:$0xff] }
 0x239   :  { %1169 = vmatprep.subr.bf16.mxu1 %v1168_v52  ;;  %1237 = vmatprep.subr.bf16.mxu0 %v1236_v58  ;;  %v1184_v43 = vpack.c.bf16 %v848_v42, %v846_v41  ;;  %v850_v52 = vld [vmem:[#allocation6 + $0x3c8] sm:$0xff] }
 0x23a   :  { %v1188_v57 = vpack.c.bf16 %v852_v54, %v850_v52  ;;  %v1298_v42 = vld [vmem:[#allocation3 + $0x68] sm:$0xff]  ;;  %v1299_v54 = vld [vmem:[#allocation3 + $0x30] sm:$0xff] }
 0x23c   :  { %1171 = vmatpush1.bf16.msra.mxu1 %v1170_v55  ;;  %1239 = vmatpush1.bf16.msra.mxu0 %v1238_v61  ;;  %v849_v55 = vld [vmem:[#allocation6 + $0x3c0] sm:$0xff] }
 0x23d   :  { %1173 = vmatprep.subr.bf16.mxu1 %v1172_v0  ;;  %1241 = vmatprep.subr.bf16.mxu0 %v1240_v2  ;;  %v1190_v58 = vpack.c.bf16 %v851_v56, %v849_v55  ;;  %v788_v61 = vld [vmem:[#allocation6 + $0x1e0] sm:$0xff]  ;;  %v854_v0 = vld [vmem:[#allocation6 + $0x3e8] sm:$0xff]  ;;  %v1194_v2 = vpack.c.bf16 %v855_v8, %v853_v7  ;;  %v1300_v56 = vld [vmem:[#allocation3 + $0x38] sm:$0xff] }
 0x23e   :  { %v1258_v24 = vpack.c.bf16 %v790_v63, %v788_v61 }
 0x240   :  { %1175 = vmatpush1.bf16.msra.mxu1 %v1174_v6  ;;  %v1192_v6 = vpack.c.bf16 %v856_v1, %v854_v0 }
 0x2a3   :  { %v554_v10 = vpop.permute.xlu1 %553 }
 0x2a4   :  { %v561_v11 = vmul.f32 %v554_v10, %v550_v9  ;;  %v774_v10 = vld [vmem:[#allocation6 + $0x170] sm:$0xff] }
 0x2a6   :  { %v563_v12 = vsel %vm529_vm6, %v561_v11, 0.0 }
 0x2a7   :  { %v564_v13 = vrot.slane %v563_v12, 4  ;;  %v559_v4 = vpop.permute.xlu1 %558 }
 0x2a8   :  { %v562_v15 = vmul.f32 %v559_v4, %v550_v9  ;;  %v772_v9 = vld [vmem:[#allocation6 + $0x160] sm:$0xff]  ;;  %v840_v4 = vld [vmem:[#allocation6 + $0x378] sm:$0xff] }
 0x2a9   :  { %v565_v3 = vadd.f32 %v564_v13, %v563_v12  ;;  %v1242_v12 = vpack.c.bf16 %v774_v10, %v772_v9  ;;  %v838_v13 = vld [vmem:[#allocation6 + $0x368] sm:$0xff] }
 0x2aa   :  { %v570_v5 = vsel %vm529_vm6, %v562_v15, 0.0 }
 0x2ab   :  { %v566_v16 = vrot.slane %v565_v3, 2  ;;  %v571_v17 = vrot.slane %v570_v5, 4  ;;  %1243 = vmatpush1.bf16.msra.mxu0 %v1242_v12 }
 0x2ad   :  { %v567_v18 = vadd.f32 %v566_v16, %v565_v3  ;;  %v572_v14 = vadd.f32 %v571_v17, %v570_v5  ;;  %v1176_v3 = vpack.c.bf16 %v840_v4, %v838_v13  ;;  %v837_v5 = vld [vmem:[#allocation6 + $0x360] sm:$0xff]  ;;  %v839_v16 = vld [vmem:[#allocation6 + $0x370] sm:$0xff] }
 0x2ae   :  { %v1178_v17 = vpack.c.bf16 %v839_v16, %v837_v5  ;;  %v1287_v13 = vld [vmem:[#allocation3] sm:$0xff]  ;;  %v1289_v5 = vld [vmem:[#allocation3 + $0x10] sm:$0xff] }
 0x2af   :  { %v568_v19 = vrot.slane %v567_v18, 1  ;;  %v573_v20 = vrot.slane %v572_v14, 2  ;;  %1177 = vmatprep.subr.bf16.mxu1 %v1176_v3  ;;  %v1288_v3 = vld [vmem:[#allocation3 + $0x8] sm:$0xff] }
 0x2b0   :  { %1179 = vmatpush1.bf16.msra.mxu1 %v1178_v17  ;;  %v1290_v17 = vld [vmem:[#allocation3 + $0x18] sm:$0xff] }
 0x2b1   :  { %v569_v22 = vadd.f32 %v568_v19, %v567_v18  ;;  %v574_v23 = vadd.f32 %v573_v20, %v572_v14  ;;  %v777_v18 = vld [vmem:[#allocation6 + $0x188] sm:$0xff]  ;;  %v779_v14 = vld [vmem:[#allocation6 + $0x198] sm:$0xff]  ;;  %v776_v20 = vld [vmem:[#allocation6 + $0x180] sm:$0xff] }
 0x2b2   :  { %v1244_v19 = vpack.c.bf16 %v779_v14, %v777_v18  ;;  %v1291_v14 = vld [vmem:[#allocation3 + $0x40] sm:$0xff] }
 0x2b3   :  { %v584_v27 = vadd.f32 %v1127_v21, %v569_v22  ;;  %v575_v28 = vrot.slane %v574_v23, 1 }
 0x2b4   :  { %1245 = vmatprep.subr.bf16.mxu0 %v1244_v19 }
 0x2b5   :  { %v1128_v30 = vmul.f32 -1.442695, %v584_v27  ;;  %v576_v31 = vadd.f32 %v575_v28, %v574_v23  ;;  %v842_v27 = vld [vmem:[#allocation6 + $0x388] sm:$0xff]  ;;  %v844_v28 = vld [vmem:[#allocation6 + $0x398] sm:$0xff] }
 0x2b7   :  { %1271 = vpow2.f32 %v1128_v30  ;;  %v585_v32 = vadd.f32 %v1127_v21, %v576_v31  ;;  %v778_v21 = vld [vmem:[#allocation6 + $0x190] sm:$0xff]  ;;  %v1180_v31 = vpack.c.bf16 %v844_v28, %v842_v27  ;;  %v1294_v27 = vld [vmem:[#allocation3 + $0x58] sm:$0xff] }
 0x2b8   :  { %v1246_v23 = vpack.c.bf16 %v778_v21, %v776_v20  ;;  %v1292_v20 = vld [vmem:[#allocation3 + $0x48] sm:$0xff] }
 0x2b9   :  { %v1129_v33 = vmul.f32 -1.442695, %v585_v32  ;;  %v841_v32 = vld [vmem:[#allocation6 + $0x380] sm:$0xff]  ;;  %1181 = vmatprep.subr.bf16.mxu1 %v1180_v31 }
 0x2ba   :  { %1247 = vmatpush1.bf16.msra.mxu0 %v1246_v23 }
 0x2bb   :  { %1273 = vpow2.f32 %v1129_v33  ;;  %v843_v33 = vld [vmem:[#allocation6 + $0x390] sm:$0xff] }
 0x2c1   :  { %v1272_v34 = vpop.eup %1271 }
 0x2c2   :  { %v592_v35 = vadd.f32 1.0, %v1272_v34  ;;  %v1182_v34 = vpack.c.bf16 %v843_v33, %v841_v32 }
 0x2c4   :  { %1275 = vrcp.f32 %v592_v35  ;;  %v781_v35 = vld [vmem:[#allocation6 + $0x1a8] sm:$0xff]  ;;  %1183 = vmatpush1.bf16.msra.mxu1 %v1182_v34  ;;  %v1295_v34 = vld [vmem:[#allocation3 + $0x20] sm:$0xff] }
 0x2c5   :  { %v1274_v44 = vpop.eup %1273  ;;  %v1248_v37 = vpack.c.bf16 %v783_v36, %v781_v35  ;;  %1185 = vmatprep.subr.bf16.mxu1 %v1184_v43  ;;  %v1296_v36 = vld [vmem:[#allocation3 + $0x28] sm:$0xff] }
 0x2c6   :  { %v593_v48 = vadd.f32 1.0, %v1274_v44  ;;  %v845_v44 = vld [vmem:[#allocation6 + $0x3a0] sm:$0xff] }
 0x2c7   :  { %1249 = vmatprep.subr.bf16.mxu0 %v1248_v37  ;;  %v1186_v46 = vpack.c.bf16 %v847_v45, %v845_v44 }
 0x2c8   :  { %1277 = vrcp.f32 %v593_v48  ;;  %1251 = vmatpush1.bf16.msra.mxu0 %v1250_v40  ;;  %v787_v48 = vld [vmem:[#allocation6 + $0x1d8] sm:$0xff]  ;;  %v1297_v40 = vld [vmem:[#allocation3 + $0x60] sm:$0xff] }
 0x2c9   :  { %v1252_v49 = vpack.c.bf16 %v787_v48, %v785_v47  ;;  %1187 = vmatpush1.bf16.msra.mxu1 %v1186_v46 }
 0x2ca   :  { %1189 = vmatprep.subr.bf16.mxu1 %v1188_v57 }
 0x2cb   :  { %1253 = vmatprep.subr.bf16.mxu0 %v1252_v49 }
 0x2cc   :  { %1255 = vmatpush1.bf16.msra.mxu0 %v1254_v53 }
 0x2cd   :  { %1257 = vmatprep.subr.bf16.mxu0 %v1256_v62  ;;  %1191 = vmatpush1.bf16.msra.mxu1 %v1190_v58  ;;  %v1301_v58 = vld [vmem:[#allocation3 + $0x70] sm:$0xff] }
 0x2ce   :  { %v1276_v11 = vpop.eup %1275  ;;  %1193 = vmatprep.subr.bf16.mxu1 %v1192_v6 }
 0x2cf   :  { %v1593_v15 = vrot.slane %v1276_v11, %v1456_v26 }
 0x2d0   :  { %1259 = vmatpush1.bf16.msra.mxu0 %v1258_v24 }
 0x2d1   :  { %607 = vbcast.lane.b32.xlu1 %v1593_v15, 264  ;;  %603 = vbcast.lane.b32.xlu0 %v1593_v15, 256 }
 0x2d2   :  { %v1278_v22 = vpop.eup %1277  ;;  %1195 = vmatpush1.bf16.msra.mxu1 %v1194_v2 }
 0x2d3   :  { %v620_v30 = vrot.slane %v1278_v22, %v1456_v26  ;;  %v1293_v22 = vld [vmem:[#allocation3 + $0x50] sm:$0xff] }
 0x2d5   :  { %626 = vbcast.lane.b32.xlu1 %v620_v30, 264  ;;  %622 = vbcast.lane.b32.xlu0 %v620_v30, 256 }
 0x2d9   :  { %630 = vbcast.lane.b32.xlu1 %v620_v30, 272  ;;  %611 = vbcast.lane.b32.xlu0 %v1593_v15, 272 }
 0x2dd   :  { %634 = vbcast.lane.b32.xlu1 %v620_v30, 280  ;;  %615 = vbcast.lane.b32.xlu0 %v1593_v15, 280 }
 0x343   :  { %v604_v9 = vpop.permute.xlu0 %603  ;;  %v608_v10 = vpop.permute.xlu1 %607 }
 0x344   :  { %v1600_v4 = vmul.f32 %v1287_v13, %v604_v9  ;;  %v1602_v15 = vmul.f32 %v1288_v3, %v604_v9  ;;  %v1604_v16 = vmul.f32 %v1289_v5, %v608_v10  ;;  %v1606_v18 = vmul.f32 %v1290_v17, %v608_v10 }
 0x346   :  { %v652_v32 = vmax.f32 %v1600_v4, %v1604_v16  ;;  %v661_v33 = vmax.f32 %v1602_v15, %v1606_v18  ;;  %v688_v38 = vadd.f32 %v1604_v16, %v1600_v4  ;;  %v697_v39 = vadd.f32 %v1606_v18, %v1602_v15 }
 0x347   :  { %v623_v11 = vpop.permute.xlu0 %622  ;;  %v627_v12 = vpop.permute.xlu1 %626 }
 0x348   :  { %v1608_v19 = vmul.f32 %v1291_v14, %v623_v11  ;;  %v1610_v21 = vmul.f32 %v1292_v20, %v623_v11  ;;  %v1612_v23 = vmul.f32 %v1293_v22, %v627_v12  ;;  %v1614_v28 = vmul.f32 %v1294_v27, %v627_v12 }
 0x34a   :  { %v670_v44 = vmax.f32 %v1608_v19, %v1612_v23  ;;  %v679_v45 = vmax.f32 %v1610_v21, %v1614_v28  ;;  %v706_v46 = vadd.f32 %v1612_v23, %v1608_v19  ;;  %v715_v47 = vadd.f32 %v1614_v28, %v1610_v21 }
 0x34b   :  { %v612_v30 = vpop.permute.xlu0 %611  ;;  %v631_v31 = vpop.permute.xlu1 %630 }
 0x34c   :  { %v1620_v35 = vmul.f32 %v1295_v34, %v612_v30  ;;  %v1622_v37 = vmul.f32 %v1296_v36, %v612_v30  ;;  %v1628_v41 = vmul.f32 %v1297_v40, %v631_v31  ;;  %v1630_v43 = vmul.f32 %v1298_v42, %v631_v31 }
 0x34e   :  { %v653_v48 = vmax.f32 %v652_v32, %v1620_v35  ;;  %v662_v49 = vmax.f32 %v661_v33, %v1622_v37  ;;  %v689_v50 = vadd.f32 %v688_v38, %v1620_v35  ;;  %v698_v51 = vadd.f32 %v697_v39, %v1622_v37 }
 0x34f   :  { %v616_v52 = vpop.permute.xlu0 %615  ;;  %v635_v53 = vpop.permute.xlu1 %634  ;;  %v671_v62 = vmax.f32 %v670_v44, %v1628_v41  ;;  %v680_v63 = vmax.f32 %v679_v45, %v1630_v43  ;;  %v707_v0 = vadd.f32 %v706_v46, %v1628_v41  ;;  %v716_v1 = vadd.f32 %v715_v47, %v1630_v43 }
 0x350   :  { %v1644_v55 = vmul.f32 %v1299_v54, %v616_v52  ;;  %v1646_v57 = vmul.f32 %v1300_v56, %v616_v52  ;;  %v1648_v59 = vmul.f32 %v1301_v58, %v635_v53  ;;  %v1650_v61 = vmul.f32 %v1302_v60, %v635_v53 }
 0x352   :  { %v654_v24 = vmax.f32 %v653_v48, %v1644_v55  ;;  %v663_v6 = vmax.f32 %v662_v49, %v1646_v57  ;;  %v690_v7 = vadd.f32 %v689_v50, %v1644_v55  ;;  %v699_v8 = vadd.f32 %v698_v51, %v1646_v57 }
 0x353   :  { %v672_v2 = vmax.f32 %v671_v62, %v1648_v59  ;;  %v681_v9 = vmax.f32 %v680_v63, %v1650_v61  ;;  %v708_v10 = vadd.f32 %v707_v0, %v1648_v59  ;;  %v717_v11 = vadd.f32 %v716_v1, %v1650_v61 }
 0x354   :  { %v655_v12 = vrot.slane %v654_v24, 4  ;;  %v664_v13 = vrot.slane %v663_v6, 4  ;;  %v691_v3 = vrot.slane %v690_v7, 4  ;;  %v700_v5 = vrot.slane %v699_v8, 4 }
 0x355   :  { %v673_v17 = vrot.slane %v672_v2, 4  ;;  %v682_v14 = vrot.slane %v681_v9, 4  ;;  %v709_v20 = vrot.slane %v708_v10, 4  ;;  %v718_v22 = vrot.slane %v717_v11, 4 }
 0x356   :  { %v656_v27 = vmax.f32 %v654_v24, %v655_v12  ;;  %v665_v30 = vmax.f32 %v663_v6, %v664_v13  ;;  %v692_v31 = vadd.f32 %v691_v3, %v690_v7  ;;  %v701_v32 = vadd.f32 %v700_v5, %v699_v8 }
 0x357   :  { %v674_v33 = vmax.f32 %v672_v2, %v673_v17  ;;  %v683_v34 = vmax.f32 %v681_v9, %v682_v14  ;;  %v710_v36 = vadd.f32 %v709_v20, %v708_v10  ;;  %v719_v38 = vadd.f32 %v718_v22, %v717_v11 }
 0x358   :  { %v657_v39 = vrot.slane %v656_v27, 2  ;;  %v693_v40 = vrot.slane %v692_v31, 2  ;;  %v666_v42 = vrot.slane %v665_v30, 2  ;;  %v702_v44 = vrot.slane %v701_v32, 2 }
 0x359   :  { %v675_v45 = vrot.slane %v674_v33, 2  ;;  %v711_v46 = vrot.slane %v710_v36, 2  ;;  %v684_v47 = vrot.slane %v683_v34, 2  ;;  %v720_v48 = vrot.slane %v719_v38, 2 }
 0x35a   :  { %v667_v49 = vmax.f32 %v665_v30, %v666_v42  ;;  %v658_v50 = vmax.f32 %v656_v27, %v657_v39  ;;  %v703_v51 = vadd.f32 %v702_v44, %v701_v32  ;;  %v694_v52 = vadd.f32 %v693_v40, %v692_v31 }
 0x35b   :  { %v685_v53 = vmax.f32 %v683_v34, %v684_v47  ;;  %v676_v54 = vmax.f32 %v674_v33, %v675_v45  ;;  %v721_v56 = vadd.f32 %v720_v48, %v719_v38  ;;  %v712_v58 = vadd.f32 %v711_v46, %v710_v36 }
 0x35c   :  { %v668_v60 = vrot.slane %v667_v49, 1  ;;  %v659_v62 = vrot.slane %v658_v50, 1  ;;  %v704_v63 = vrot.slane %v703_v51, 1  ;;  %v695_v0 = vrot.slane %v694_v52, 1 }
 0x35d   :  { %v686_v1 = vrot.slane %v685_v53, 1  ;;  %v677_v24 = vrot.slane %v676_v54, 1  ;;  %v722_v6 = vrot.slane %v721_v56, 1  ;;  %v713_v7 = vrot.slane %v712_v58, 1 }
 0x35e   :  { %v669_v8 = vmax.f32 %v667_v49, %v668_v60  ;;  %v660_v2 = vmax.f32 %v658_v50, %v659_v62  ;;  %v705_v9 = vadd.f32 %v704_v63, %v703_v51  ;;  %v696_v10 = vadd.f32 %v695_v0, %v694_v52 }
 0x35f   :  { %v687_v11 = vmax.f32 %v685_v53, %v686_v1  ;;  %v678_v12 = vmax.f32 %v676_v54, %v677_v24  ;;  %v723_v13 = vadd.f32 %v722_v6, %v721_v56  ;;  %v714_v3 = vadd.f32 %v713_v7, %v712_v58 }
 0x360   :  { %v725_v5 = vmul.f32 0.03125, %v705_v9  ;;  %v724_v17 = vmul.f32 0.03125, %v696_v10  ;;  %v1016_v36 = vstv %s1713_s6  ;;  %v1380_v51 = vmov 1966171168   ;;  %s1381_s6 = smov [#allocation8]  }
 0x361   :  { %v941_v14 = vsel %vm518_vm3, %v687_v11, %v669_v8  ;;  %v940_v20 = vsel %vm518_vm3, %v678_v12, %v660_v2  ;;  %v727_v22 = vmul.f32 0.03125, %v723_v13  ;;  %v726_v27 = vmul.f32 0.03125, %v714_v3  ;;  %s1113_s8 = sshll.u32 %s1381_s6, 4  ;;  %s1114_s8 = int_to_ptr.vmem [resolvable:$true] %s1113_s8 }
 0x362   :  { %1008 = vmatprep.mubr.f32.mxu0 %v941_v14  ;;  %v1035_v52 = vunpack.c.l.s4 %v1380_v51  ;;  %s1347_s9 = scalar_lea.vmem %s1114_s8, 2048  ;;  %p1352_p3 = scmp.lt.s32.totalorder %s1114_s8, %s1114_s8 }
 0x363   :  { %1009 = vmatmul.mubr.f32.vlgmr.msra.gmra.mrb[0].mxu0 %v940_v20  ;;  %v862_v30 = vsel %vm518_vm3, %v727_v22, %v725_v5  ;;  %v861_v31 = vsel %vm518_vm3, %v726_v27, %v724_v17  ;;  %p1348_p2 = scmp.ne.s32.totalorder %s1114_s8, %s1347_s9  ;;  %p1353_p4 = scmp.lt.s32.totalorder %s1347_s9, %s1347_s9 }
 0x364   :  { %929 = vmatprep.mubr.f32.mxu1 %v862_v30  ;;  %v1036_v53 = vunpack.c.0.s8 %v1035_v52 }
 0x365   :  { %930 = vmatmul.mubr.f32.vlgmr.msra.gmra.mrb[0].mxu1 %v861_v31  ;;  %p1354_p5 = por %p1353_p4, %p1352_p3 }
 0x366   :  { %v1039_v56 = vsub.s32 %v1036_v53, %v1453_v25 }
 0x367   :  { %p1355_p6 = pnand %p1354_p5, %p1348_p2 }
 0x436   :  { %v1010_v32 = vpop.f32.mrb[0].mxu0 }
 0x437   :  { %v1012_v33 = vpop.f32.mrb[1].mxu0 }
 0x438   :  { %v931_v34 = vpop.f32.mrb[0].mxu1 }
 0x439   :  { %v1011_v38 = vadd.f32 %v1010_v32, %v931_v34  ;;  %v933_v39 = vpop.f32.mrb[1].mxu1 }
 0x43a   :  { %v1013_v40 = vadd.f32 %v1012_v33, %v933_v39 }
 0x43b   :  { %v1017_v42 = vadd.f32 %v1016_v36, %v1011_v38 }
 0x43c   :  { %v1018_v44 = vadd.f32 %v1016_v36, %v1013_v40 }
 0x43d   :  { %v1130_v45 = vmul.f32 -1.442695, %v1017_v42 }
 0x43e   :  { %v1131_v46 = vmul.f32 -1.442695, %v1018_v44 }
 0x43f   :  { %1279 = vpow2.f32 %v1130_v45 }
 0x440   :  { %1281 = vpow2.f32 %v1131_v46 }
 0x449   :  { %v1280_v47 = vpop.eup %1279 }
 0x44a   :  { %v1282_v48 = vpop.eup %1281  ;;  %v1025_v49 = vadd.f32 1.0, %v1280_v47 }
 0x44b   :  { %v1026_v50 = vadd.f32 1.0, %v1282_v48 }
 0x44c   :  { %1283 = vrcp.f32 %v1025_v49 }
 0x44d   :  { %1285 = vrcp.f32 %v1026_v50 }
 0x456   :  { %v1284_v54 = vpop.eup %1283 }
 0x457   :  { %v1286_v58 = vpop.eup %1285 }
 0x458   :  { %v1033_v60 = vcombine.low %v1284_v54, %v1286_v58 }
 0x45a   :  { %v1040_v62 = vrot.slane %v1033_v60, %v1039_v56 }
 0x45c   :  { %v1041_v63 = vcombine.high %v1040_v62, %v1040_v62  ;;  %v1048_v0 = vrot.slane %v1040_v62, %v1039_v56 }
 0x45e   :  { %v1055_v1 = vrot.slane %v1041_v63, %v1039_v56  ;;  %v1059_v24 = vrot.slane %v1048_v0, %v1456_v26  ;;  %v1063_v6 = vrot.slane %v1048_v0, %v1463_v29 }
 0x460   :  { %v1067_v7 = vrot.slane %v1055_v1, %v1456_v26  ;;  %v1071_v8 = vrot.slane %v1055_v1, %v1463_v29  ;;  %v1076_v2 = vmul.f32 %v1059_v24, %v1600_v4  ;;  %v1077_v9 = vmul.f32 %v1063_v6, %v1602_v15 }
 0x461   :  { %v1078_v25 = vmul.f32 %v1059_v24, %v1604_v16  ;;  %v1079_v10 = vmul.f32 %v1063_v6, %v1606_v18  ;;  %v1080_v11 = vmul.f32 %v1059_v24, %v1620_v35  ;;  %v1081_v12 = vmul.f32 %v1063_v6, %v1622_v37 }
 0x462   :  { %v1082_v13 = vmul.f32 %v1059_v24, %v1644_v55  ;;  %v1083_v26 = vmul.f32 %v1063_v6, %v1646_v57  ;;  %v1084_v29 = vmul.f32 %v1067_v7, %v1608_v19  ;;  %v1085_v4 = vmul.f32 %v1071_v8, %v1610_v21  ;;  %1092 = vst [vmem:[#allocation8] sm:$0xff] %v1076_v2 }
 0x463   :  { %1093 = vst [vmem:[#allocation8 + $0x8] sm:$0xff] %v1077_v9  ;;  %v1086_v15 = vmul.f32 %v1067_v7, %v1612_v23  ;;  %v1087_v16 = vmul.f32 %v1071_v8, %v1614_v28  ;;  %v1088_v18 = vmul.f32 %v1067_v7, %v1628_v41  ;;  %v1089_v35 = vmul.f32 %v1071_v8, %v1630_v43 }
 0x464   :  { %1094 = vst [vmem:[#allocation8 + $0x10] sm:$0xff] %v1078_v25  ;;  %1095 = vst [vmem:[#allocation8 + $0x18] sm:$0xff] %v1079_v10  ;;  %v1090_v37 = vmul.f32 %v1067_v7, %v1648_v59  ;;  %v1091_v19 = vmul.f32 %v1071_v8, %v1650_v61 }
 0x465   :  { %1096 = vst [vmem:[#allocation8 + $0x20] sm:$0xff] %v1080_v11  ;;  %1097 = vst [vmem:[#allocation8 + $0x28] sm:$0xff] %v1081_v12 }
 0x466   :  { %1098 = vst [vmem:[#allocation8 + $0x30] sm:$0xff] %v1082_v13  ;;  %1099 = vst [vmem:[#allocation8 + $0x38] sm:$0xff] %v1083_v26 }
 0x467   :  { %1100 = vst [vmem:[#allocation8 + $0x40] sm:$0xff] %v1084_v29  ;;  %1101 = vst [vmem:[#allocation8 + $0x48] sm:$0xff] %v1085_v4 }
 0x468   :  { %1102 = vst [vmem:[#allocation8 + $0x50] sm:$0xff] %v1086_v15  ;;  %1103 = vst [vmem:[#allocation8 + $0x58] sm:$0xff] %v1087_v16 }
 0x469   :  { %1104 = vst [vmem:[#allocation8 + $0x60] sm:$0xff] %v1088_v18  ;;  %1105 = vst [vmem:[#allocation8 + $0x68] sm:$0xff] %v1089_v35 }
 0x46a   :  { %1106 = vst [vmem:[#allocation8 + $0x70] sm:$0xff] %v1090_v37  ;;  %1107 = vst [vmem:[#allocation8 + $0x78] sm:$0xff] %v1091_v19 }
 0x46b   :  { %1358 = shalt.err (!%p1355_p6)
}
 0x46c   :  { %s1359_s14 = scalar_lea.hbm %s1714_s7, 2048 }
 0x46d   :  { %p1360_p7 = scmp.ne.s32.totalorder %s1714_s7, %s1359_s14  ;;  %p1363_p8 = scmp.lt.u32.totalorder %s1359_s14, %s1714_s7 }
 0x46f   :  { %p1365_p9 = pnand %p1363_p8, %p1360_p7 }
 0x471   :  { %1368 = shalt.err (!%p1365_p9)
}
 0x472   :  { %1119 = dma.vmem_to_hbm [thread:$0]  %s1114_s8, 2048, %s1714_s7, [#allocation5], %s1376_s11, %s1376_s11, %s1377_s12  }
 0x473   :  { %1373 = dma.done.wait [#allocation5], 2048  }
 0x474   :  { %1374 = vsyncadd [#allocation5], 4294965248 }
 0x475   :  { %1123 = vsyncpa [#allocation4], 1 }
 0x476   :  { %1124 = vsyncpa [#allocation7], 1 }
 0x477   :  { %1125 = vsyncpa [#allocation5], 1 }

</bundles_post_ra>
